<compile_context>
chip_gen: v6e
topology: v6e:2x2x1
jax: 0.10.0
libtpu: 0.0.40
codegen_flags: <defaults>
</compile_context>

<pallas_src>
import functools

import jax
import jax.numpy as jnp
from jax.experimental import pallas as pl
from jax.experimental.pallas import tpu as pltpu


def _round_up(x, m):
    return (x + m - 1) // m * m


# ---------------------------------------------------------------------------
# Fused kernel: h = x; for each layer: h = f(h @ W_l + b_l); store task slice.
# refs = (x_ref, W0, b0, W1, b1, ..., W_{depth-1}, b_{depth-1}, out_ref)
# ---------------------------------------------------------------------------
def _make_fused_kernel(depth, tile_rows, d_out):
    def kernel(*refs):
        x_ref, o_ref = refs[0], refs[-1]
        h = x_ref[...]
        for l in range(depth):
            w = refs[1 + 2 * l][...]
            b_ref = refs[2 + 2 * l]                      # (8, p_out), rows replicated
            if tile_rows <= b_ref.shape[0]:
                b = b_ref[0:tile_rows, :]                # exact-shape vadd, no broadcast
            else:
                b = b_ref[0:1, :]                        # broadcast over big batch tiles
            h = jnp.dot(h, w, preferred_element_type=jnp.float32) + b
            if l != depth - 1:                           # last LateralBlock not activated
                h = jnp.maximum(h, 0.0)
        # Task column lives in lanes [0, d_out); store it directly (no host slice).
        o_ref[...] = h[:, :d_out].astype(o_ref.dtype)
    return kernel


# ---------------------------------------------------------------------------
# Parameter construction (mirrors nn.Linear structure of the PyTorch module)
# ---------------------------------------------------------------------------
def init_prognet_params(key, dims, num_columns):
    depth = len(dims) - 1
    columns = []
    for c in range(num_columns):
        blocks, laterals = [], []
        for l in range(depth):
            key, k1, k2 = jax.random.split(key, 3)
            W = 0.1 * jax.random.normal(k1, (dims[l], dims[l + 1]), jnp.float32)
            b = 0.1 * jax.random.normal(k2, (dims[l + 1],), jnp.float32)
            blocks.append((W, b))
            lats = []
            if l > 0:
                for _ in range(c):                       # one lateral per previous column
                    key, k3, k4 = jax.random.split(key, 3)
                    U = 0.1 * jax.random.normal(k3, (dims[l], dims[l + 1]), jnp.float32)
                    cb = 0.1 * jax.random.normal(k4, (dims[l + 1],), jnp.float32)
                    lats.append((U, cb))
            laterals.append(lats)
        columns.append((blocks, laterals))
    return columns


# ---------------------------------------------------------------------------
# Packing (done once, outside the hot path)
# ---------------------------------------------------------------------------
def pack_prognet_params(params, dims, task_id=-1):
    """Pack per-column params into per-layer block matrices with pre-summed biases.

    Columns beyond the task column are pruned (their outputs are dead).  The last
    layer packs ONLY the task column's block (+ its laterals) into lanes
    [0, d_last), so the kernel can emit the final answer without a host slice.
    Biases are pre-broadcast to 8 sublanes (plain VPU vadd in the kernel).
    """
    C = len(params)
    if not (-C <= task_id < C):
        raise IndexError(f"task_id {task_id} out of range for {C} columns")
    c_t = task_id % C
    c_eff = c_t + 1                                      # columns actually needed
    depth = len(dims) - 1
    packed = []
    for l in range(depth):
        d_in, d_out = dims[l], dims[l + 1]
        last = (l == depth - 1)
        p_in = d_in if l == 0 else _round_up(c_eff * d_in, 128)
        p_out = _round_up(d_out if last else c_eff * d_out, 128)
        W = jnp.zeros((p_in, p_out), jnp.float32)
        b = jnp.zeros((p_out,), jnp.float32)
        cols = [c_t] if last else list(range(c_eff))
        for c in cols:
            blocks_c, laterals_c = params[c]
            Wc, bc = blocks_c[l]
            out_off = 0 if last else c * d_out
            cs = slice(out_off, out_off + d_out)
            rs = slice(0, d_in) if l == 0 else slice(c * d_in, (c + 1) * d_in)
            W = W.at[rs, cs].set(Wc)
            bsum = bc
            for j, (U, cb) in enumerate(laterals_c[l]):  # lateral from column j (< c)
                W = W.at[j * d_in:(j + 1) * d_in, cs].set(U)
                bsum = bsum + cb
            b = b.at[cs].set(bsum)
        b8 = jnp.broadcast_to(b[None, :], (8, p_out)) + jnp.zeros((8, p_out), jnp.float32)
        packed.append((W, b8))
    return packed


# ---------------------------------------------------------------------------
# Forward pass: one jitted call -> one pallas_call (no pad, no slice ops)
# ---------------------------------------------------------------------------
@functools.partial(jax.jit, static_argnames=("dims",))
def prognet_forward_pallas(packed, x, *, dims):
    depth = len(dims) - 1
    d_last = dims[-1]
    B, d0 = x.shape

    flat = [x]
    for W, b in packed:
        flat += [W, b]

    # VMEM budget guard (matters when the packed (C*d)^2 matrices grow; on v7x the
    # ceiling is 64 MiB physical / 32 MiB scoped default).
    weight_bytes = sum(int(W.size + b.size) * 4 for W, b in packed)
    act_bytes = 4 * max(8, B) * max(W.shape[1] for W, _ in packed) * 2
    est_vmem = weight_bytes + act_bytes + x.size * 4
    cp_kwargs = {}
    if est_vmem > (32 << 20):
        cp_kwargs["vmem_limit_bytes"] = min(est_vmem + (8 << 20), 128 << 20)

    if B >= 16 and B % 8 == 0:
        # ---- Large-batch path: parallel grid over batch tiles (megacore on v7x).
        tb = min(128, B)
        while B % tb:
            tb -= 8
        if B // tb < 2 and tb % 16 == 0:                 # ensure >= 2 tiles for 2 TCs
            tb //= 2
        in_specs = [pl.BlockSpec((tb, d0), lambda i: (i, 0))]
        for _ in packed:                                 # weights: whole-array VMEM,
            in_specs += [                                # NOT pipelined / double-buffered
                pl.BlockSpec(memory_space=pltpu.MemorySpace.VMEM),
                pl.BlockSpec(memory_space=pltpu.MemorySpace.VMEM),
            ]
        out = pl.pallas_call(
            _make_fused_kernel(depth, tb, d_last),
            out_shape=jax.ShapeDtypeStruct((B, d_last), x.dtype),
            grid=(B // tb,),
            in_specs=in_specs,
            out_specs=pl.BlockSpec((tb, d_last), lambda i: (i, 0)),
            compiler_params=pltpu.CompilerParams(
                dimension_semantics=("parallel",), **cp_kwargs),
        )(*flat)
    else:
        # ---- Small-batch path (B=2 here): single invocation, whole arrays in VMEM.
        # Block shapes equal full array dims, so no padding is required anywhere.
        specs = [pl.BlockSpec(memory_space=pltpu.MemorySpace.VMEM)] * len(flat)
        compiler_params = pltpu.CompilerParams(**cp_kwargs) if cp_kwargs else None
        out = pl.pallas_call(
            _make_fused_kernel(depth, B, d_last),
            out_shape=jax.ShapeDtypeStruct((B, d_last), x.dtype),
            in_specs=specs,
            out_specs=pl.BlockSpec(memory_space=pltpu.MemorySpace.VMEM),
            compiler_params=compiler_params,
        )(*flat)
    return out


# ---------------------------------------------------------------------------
# Pure-JAX reference mirroring the PyTorch forward (exact f32 matmuls)
# ---------------------------------------------------------------------------
def prognet_forward_ref(params, x, depth, task_id=-1):
    dot = functools.partial(jnp.dot, precision=jax.lax.Precision.HIGHEST)
    ncols = len(params)
    inputs = [
        jax.nn.relu(dot(x, params[c][0][0][0]) + params[c][0][0][1])
        for c in range(ncols)
    ]
    out = inputs
    for l in range(1, depth):
        out = []
        for c in range(ncols):
            W, b = params[c][0][l]
            res = dot(inputs[c], W) + b
            for j, (U, cb) in enumerate(params[c][1][l]):
                res = res + (dot(inputs[j], U) + cb)
            if l != depth - 1:
                res = jax.nn.relu(res)
            out.append(res)
        inputs = out
    return out[task_id]


if __name__ == "__main__":
    B = 2
    dims = (32, 64, 48, 16)       # Linear dims per column: 32 -> 64 -> 48 -> 16
    depth = len(dims) - 1         # 3 LateralBlocks per column
    num_columns = 2               # two tasks added via new_task
    task_id = -1                  # last column (PyTorch default)

    key = jax.random.PRNGKey(0)
    key, kx = jax.random.split(key)
    x = jax.random.normal(kx, (B, dims[0]), jnp.float32)

    params = init_prognet_params(key, dims, num_columns)
    packed = pack_prognet_params(params, dims, task_id=task_id)

    y = prognet_forward_pallas(packed, x, dims=dims)
    y = jax.block_until_ready(y)

    y_ref = prognet_forward_ref(params, x, depth, task_id=task_id)
    assert y.shape == (B, dims[-1]), y.shape
    assert jnp.allclose(y, y_ref, atol=1e-4, rtol=1e-4), (
        float(jnp.max(jnp.abs(y - y_ref))))

    print("KERNEL_OK")
</pallas_src>

<mosaic_0001>
module attributes {stable_mosaic.version = 11 : i64} {
  func.func @kernel(%arg0: memref<2x32xf32, #tpu.memory_space<vmem>>, %arg1: memref<32x128xf32, #tpu.memory_space<vmem>>, %arg2: memref<8x128xf32, #tpu.memory_space<vmem>>, %arg3: memref<128x128xf32, #tpu.memory_space<vmem>>, %arg4: memref<8x128xf32, #tpu.memory_space<vmem>>, %arg5: memref<128x128xf32, #tpu.memory_space<vmem>>, %arg6: memref<8x128xf32, #tpu.memory_space<vmem>>, %arg7: memref<2x16xf32, #tpu.memory_space<vmem>>) attributes {dimension_semantics = [], scalar_prefetch = 0 : i64, scratch_operands = 0 : i64, tpu.core_type = #tpu.core_type<tc>} {
    %c0 = arith.constant 0 : index
    %c0_0 = arith.constant 0 : index
    %0 = vector.load %arg0[%c0, %c0_0] : memref<2x32xf32, #tpu.memory_space<vmem>>, vector<2x32xf32>
    %c0_1 = arith.constant 0 : index
    %c0_2 = arith.constant 0 : index
    %1 = vector.load %arg1[%c0_1, %c0_2] : memref<32x128xf32, #tpu.memory_space<vmem>>, vector<32x128xf32>
    %c0_3 = arith.constant 0 : index
    %c0_4 = arith.constant 0 : index
    %2 = vector.load %arg2[%c0_3, %c0_4] : memref<8x128xf32, #tpu.memory_space<vmem>>, vector<2x128xf32>
    %cst = arith.constant dense<0.000000e+00> : vector<2x128xf32>
    %3 = tpu.matmul %0, %1, %cst {dimension_numbers = #tpu.dot_dimension_numbers<[1], [0], [0], [1], [0, 0, 1, 1], [], []>} : vector<2x32xf32>, vector<32x128xf32>, vector<2x128xf32> -> vector<2x128xf32>
    %4 = arith.addf %3, %2 : vector<2x128xf32>
    %cst_5 = arith.constant 0.000000e+00 : f32
    %5 = vector.broadcast %cst_5 : f32 to vector<2x128xf32>
    %6 = arith.maximumf %4, %5 : vector<2x128xf32>
    %c0_6 = arith.constant 0 : index
    %c0_7 = arith.constant 0 : index
    %7 = vector.load %arg3[%c0_6, %c0_7] : memref<128x128xf32, #tpu.memory_space<vmem>>, vector<128x128xf32>
    %c0_8 = arith.constant 0 : index
    %c0_9 = arith.constant 0 : index
    %8 = vector.load %arg4[%c0_8, %c0_9] : memref<8x128xf32, #tpu.memory_space<vmem>>, vector<2x128xf32>
    %cst_10 = arith.constant dense<0.000000e+00> : vector<2x128xf32>
    %9 = tpu.matmul %6, %7, %cst_10 {dimension_numbers = #tpu.dot_dimension_numbers<[1], [0], [0], [1], [0, 0, 1, 1], [], []>} : vector<2x128xf32>, vector<128x128xf32>, vector<2x128xf32> -> vector<2x128xf32>
    %10 = arith.addf %9, %8 : vector<2x128xf32>
    %cst_11 = arith.constant 0.000000e+00 : f32
    %11 = vector.broadcast %cst_11 : f32 to vector<2x128xf32>
    %12 = arith.maximumf %10, %11 : vector<2x128xf32>
    %c0_12 = arith.constant 0 : index
    %c0_13 = arith.constant 0 : index
    %13 = vector.load %arg5[%c0_12, %c0_13] : memref<128x128xf32, #tpu.memory_space<vmem>>, vector<128x128xf32>
    %c0_14 = arith.constant 0 : index
    %c0_15 = arith.constant 0 : index
    %14 = vector.load %arg6[%c0_14, %c0_15] : memref<8x128xf32, #tpu.memory_space<vmem>>, vector<2x128xf32>
    %cst_16 = arith.constant dense<0.000000e+00> : vector<2x128xf32>
    %15 = tpu.matmul %12, %13, %cst_16 {dimension_numbers = #tpu.dot_dimension_numbers<[1], [0], [0], [1], [0, 0, 1, 1], [], []>} : vector<2x128xf32>, vector<128x128xf32>, vector<2x128xf32> -> vector<2x128xf32>
    %16 = arith.addf %15, %14 : vector<2x128xf32>
    %17 = vector.extract_strided_slice %16 {offsets = [0, 0], sizes = [2, 16], strides = [1, 1]} : vector<2x128xf32> to vector<2x16xf32>
    %c0_17 = arith.constant 0 : index
    %c0_18 = arith.constant 0 : index
    %18 = vector.load %arg7[%c0_17, %c0_18] : memref<2x16xf32, #tpu.memory_space<vmem>>, vector<2x16xf32>
    tpu.vector_store %arg7[%c0_17, %c0_18], %17 {strides = array<i32>} : memref<2x16xf32, #tpu.memory_space<vmem>>, vector<2x16xf32>,
    return
  }
}

</mosaic_0001>

<bundles_post_ra>
// kernel: prognet_forward_pallas.1
= control target key start
LH: loop header
LB: loop body
LE: loop exit
PB: predicated region body
PF: predicated region fallthrough
CT: control target
= control target key end

     0   :  { %12 = vsyncpa [#allocation3], 0  ;;  %s741_s0 = inlined_call_operand.vmem [shape: f32[2,32], index: 0, kind: input, shape index: {}]   ;;  %s742_s1 = inlined_call_operand.hbm [shape: f32[32,128], index: 1, kind: input, shape index: {}]   ;;  %s743_s2 = inlined_call_operand.hbm [shape: f32[8,128], index: 2, kind: input, shape index: {}]   ;;  %s744_s3 = inlined_call_operand.hbm [shape: f32[128,128], index: 3, kind: input, shape index: {}]   ;;  %s745_s4 = inlined_call_operand.hbm [shape: f32[8,128], index: 4, kind: input, shape index: {}]   ;;  %s746_s5 = inlined_call_operand.hbm [shape: f32[128,128], index: 5, kind: input, shape index: {}]   ;;  %s747_s6 = inlined_call_operand.vmem [shape: f32[8,128], index: 6, kind: input, shape index: {}]   ;;  %s748_s7 = inlined_call_operand.hbm [shape: f32[2,16], index: 7, kind: output, shape index: {}]  }
   0x1   :  { %13 = vsyncpa [#allocation6], 0 }
   0x2   :  { %14 = vsyncpa [#allocation9], 0 }
   0x3   :  { %15 = vsyncpa [#allocation4], 0  ;;  %s625_s24 = smov [#allocation5]   ;;  %s626_s26 = smov [#allocation8]  }
   0x4   :  { %s36_s25 = sshll.u32 %s625_s24, 4  ;;  %s58_s27 = sshll.u32 %s626_s26, 4  ;;  %s37_s25 = int_to_ptr.vmem [resolvable:$true] %s36_s25  ;;  %s59_s27 = int_to_ptr.vmem [resolvable:$true] %s58_s27 }
   0x5   :  { %s505_s28 = scalar_lea.vmem %s37_s25, 128  ;;  %p510_p1 = scmp.lt.s32.totalorder %s37_s25, %s37_s25 }
   0x6   :  { %p506_p0 = scmp.ne.s32.totalorder %s37_s25, %s505_s28  ;;  %p511_p2 = scmp.lt.s32.totalorder %s505_s28, %s505_s28 }
   0x8   :  { %p512_p3 = por %p511_p2, %p510_p1 }
   0xa   :  { %p513_p4 = pnand %p512_p3, %p506_p0 }
   0xc   :  { %516 = shalt.err (!%p513_p4)
}
   0xd   :  { %39 = dma.hbm_to_vmem [thread:$0]  %s743_s2, 128, %s37_s25, [#allocation6]  }
   0xe   :  { %s525_s8 = scalar_lea.vmem %s59_s27, 128  ;;  %p530_p6 = scmp.lt.s32.totalorder %s59_s27, %s59_s27 }
   0xf   :  { %p526_p5 = scmp.ne.s32.totalorder %s59_s27, %s525_s8  ;;  %p531_p7 = scmp.lt.s32.totalorder %s525_s8, %s525_s8 }
  0x11   :  { %p532_p8 = por %p531_p7, %p530_p6 }
  0x13   :  { %p533_p9 = pnand %p532_p8, %p526_p5 }
  0x15   :  { %536 = shalt.err (!%p533_p9)
}
  0x16   :  { %61 = dma.hbm_to_vmem [thread:$0]  %s745_s4, 128, %s59_s27, [#allocation9]  }
  0x17   :  { %s627_s11 = smov [#allocation2]  }
  0x18   :  { %s23_s12 = sshll.u32 %s627_s11, 4  ;;  %s24_s12 = int_to_ptr.vmem [resolvable:$true] %s23_s12 }
  0x19   :  { %s545_s13 = scalar_lea.vmem %s24_s12, 512  ;;  %p550_p11 = scmp.lt.s32.totalorder %s24_s12, %s24_s12 }
  0x1a   :  { %p546_p10 = scmp.ne.s32.totalorder %s24_s12, %s545_s13  ;;  %p551_p12 = scmp.lt.s32.totalorder %s545_s13, %s545_s13 }
  0x1c   :  { %p552_p13 = por %p551_p12, %p550_p11 }
  0x1e   :  { %p553_p0 = pnand %p552_p13, %p546_p10 }
  0x20   :  { %556 = shalt.err (!%p553_p0)
}
  0x21   :  { %s628_s2 = smov 128   ;;  %s629_s14 = smov 8  }
  0x22   :  { %29 = dma.hbm_to_vmem [thread:$0]  %s742_s1, 512, %s24_s12, [#allocation3], %s628_s2, %s628_s2, %s629_s14  }
  0x23   :  { %s630_s17 = smov [#allocation7]   ;;  %s631_s4 = smov [#allocation10]  }
  0x24   :  { %s45_s18 = sshll.u32 %s630_s17, 4  ;;  %s67_s19 = sshll.u32 %s631_s4, 4  ;;  %s46_s18 = int_to_ptr.vmem [resolvable:$true] %s45_s18  ;;  %s68_s19 = int_to_ptr.vmem [resolvable:$true] %s67_s19 }
  0x25   :  { %s565_s20 = scalar_lea.vmem %s46_s18, 2048  ;;  %p570_p2 = scmp.lt.s32.totalorder %s46_s18, %s46_s18 }
  0x26   :  { %p566_p1 = scmp.ne.s32.totalorder %s46_s18, %s565_s20  ;;  %p571_p3 = scmp.lt.s32.totalorder %s565_s20, %s565_s20 }
  0x28   :  { %p572_p4 = por %p571_p3, %p570_p2 }
  0x2a   :  { %p573_p5 = pnand %p572_p4, %p566_p1 }
  0x2c   :  { %576 = shalt.err (!%p573_p5)
}
  0x2d   :  { %51 = dma.hbm_to_vmem [thread:$0]  %s744_s3, 2048, %s46_s18, [#allocation6], %s628_s2, %s628_s2, %s629_s14  }
  0x2e   :  { %s585_s23 = scalar_lea.vmem %s68_s19, 2048  ;;  %p590_p7 = scmp.lt.s32.totalorder %s68_s19, %s68_s19 }
  0x2f   :  { %p586_p6 = scmp.ne.s32.totalorder %s68_s19, %s585_s23  ;;  %p591_p8 = scmp.lt.s32.totalorder %s585_s23, %s585_s23 }
  0x31   :  { %p592_p9 = por %p591_p8, %p590_p7 }
  0x33   :  { %p593_p10 = pnand %p592_p9, %p586_p6 }
  0x35   :  { %596 = shalt.err (!%p593_p10)
}
  0x36   :  { %73 = dma.hbm_to_vmem [thread:$0]  %s746_s5, 2048, %s68_s19, [#allocation9], %s628_s2, %s628_s2, %s629_s14  }
  0x37   :  { %617 = dma.done.wait [#allocation3], 512  }
  0x38   :  { %618 = vsyncadd [#allocation3], 4294966784 }
  0x39   :  { %619 = dma.done.wait [#allocation6], 2176  }
  0x3a   :  { %620 = vsyncadd [#allocation6], 4294965120 }
  0x3b   :  { %621 = dma.done.wait [#allocation9], 2176  }
  0x3c   :  { %622 = vsyncadd [#allocation9], 4294965120  ;;  %v632_v0 = vmov 0.0   ;;  %vm633_vm0 = vmmov 0   ;;  %v95_v1 = vld [vmem:[#allocation2 + $0x18] sm:$0xff]  ;;  %v94_v2 = vld [vmem:[#allocation2 + $0x10] sm:$0xff] }
  0x3d   :  { %406 = vmatprep.subr.mxu0 %v632_v0  ;;  %414 = vmatprep.mubr.msk.f32.mxu0 %vm633_vm0, %v632_v0  ;;  %v187_v3 = vld [vmem:[#allocation7 + $0x78] sm:$0xff]  ;;  %v93_v4 = vld [vmem:[#allocation2 + $0x8] sm:$0xff]  ;;  %v186_v5 = vld [vmem:[#allocation7 + $0x70] sm:$0xff]  ;;  %vm97_vm1 = vcmask 261120   ;;  %s634_s26 = smov [#allocation11]   ;;  %vm347_vm2 = vcmask 123904  }
  0x3e   :  { %417 = vmatprep.subr.mxu1 %v632_v0  ;;  %449 = vmatprep.mubr.msk.f32.mxu1 %vm633_vm0, %v632_v0  ;;  %v185_v6 = vld [vmem:[#allocation7 + $0x68] sm:$0xff]  ;;  %v92_v7 = vld [vmem:[#allocation2] sm:$0xff]  ;;  %v184_v9 = vld [vmem:[#allocation7 + $0x60] sm:$0xff]  ;;  %s355_s27 = sshll.u32 %s634_s26, 4  ;;  %s356_s27 = int_to_ptr.vmem [resolvable:$true] %s355_s27 }
  0x3f   :  { %407 = vmatpush3.msra.mxu0 %v95_v1  ;;  %418 = vmatpush3.msra.mxu1 %v187_v3  ;;  %v91_v8 = vld [vmem:[%s741_s0] sm:$0x3]  ;;  %v182_v11 = vld [vmem:[#allocation7 + $0x50] sm:$0xff]  ;;  %v181_v12 = vld [vmem:[#allocation7 + $0x48] sm:$0xff]  ;;  %s597_s28 = scalar_lea.vmem %s356_s27, 32  ;;  %p602_p12 = scmp.lt.s32.totalorder %s356_s27, %s356_s27 }
  0x40   :  { %408 = vmatprep.subr.mxu0 %v632_v0  ;;  %419 = vmatprep.subr.mxu1 %v632_v0  ;;  %v183_v10 = vld [vmem:[#allocation7 + $0x58] sm:$0xff]  ;;  %v180_v13 = vld [vmem:[#allocation7 + $0x40] sm:$0xff]  ;;  %v178_v15 = vld [vmem:[#allocation7 + $0x30] sm:$0xff]  ;;  %p598_p11 = scmp.ne.s32.totalorder %s356_s27, %s597_s28  ;;  %p603_p13 = scmp.lt.s32.totalorder %s597_s28, %s597_s28 }
  0x41   :  { %409 = vmatpush3.msra.mxu0 %v94_v2  ;;  %420 = vmatpush3.msra.mxu1 %v186_v5  ;;  %v179_v14 = vld [vmem:[#allocation7 + $0x38] sm:$0xff]  ;;  %v177_v16 = vld [vmem:[#allocation7 + $0x28] sm:$0xff]  ;;  %v176_v17 = vld [vmem:[#allocation7 + $0x20] sm:$0xff] }
  0x42   :  { %410 = vmatprep.subr.mxu0 %v632_v0  ;;  %421 = vmatprep.subr.mxu1 %v632_v0  ;;  %v175_v18 = vld [vmem:[#allocation7 + $0x18] sm:$0xff]  ;;  %v174_v19 = vld [vmem:[#allocation7 + $0x10] sm:$0xff]  ;;  %v173_v20 = vld [vmem:[#allocation7 + $0x8] sm:$0xff]  ;;  %p604_p0 = por %p603_p13, %p602_p12 }
  0x43   :  { %411 = vmatpush3.msra.mxu0 %v93_v4  ;;  %422 = vmatpush3.msra.mxu1 %v185_v6  ;;  %v172_v21 = vld [vmem:[#allocation7] sm:$0xff]  ;;  %v274_v23 = vld [vmem:[#allocation10 + $0x70] sm:$0xff]  ;;  %v273_v24 = vld [vmem:[#allocation10 + $0x68] sm:$0xff] }
  0x44   :  { %412 = vmatprep.subr.mxu0 %v632_v0  ;;  %423 = vmatprep.subr.mxu1 %v632_v0  ;;  %v275_v22 = vld [vmem:[#allocation10 + $0x78] sm:$0xff]  ;;  %v272_v25 = vld [vmem:[#allocation10 + $0x60] sm:$0xff]  ;;  %v270_v27 = vld [vmem:[#allocation10 + $0x50] sm:$0xff]  ;;  %p605_p1 = pnand %p604_p0, %p598_p11 }
  0x45   :  { %413 = vmatpush3.msra.mxu0 %v92_v7  ;;  %424 = vmatpush3.msra.mxu1 %v184_v9  ;;  %v271_v26 = vld [vmem:[#allocation10 + $0x58] sm:$0xff]  ;;  %v269_v28 = vld [vmem:[#allocation10 + $0x48] sm:$0xff]  ;;  %v268_v29 = vld [vmem:[#allocation10 + $0x40] sm:$0xff] }
  0x46   :  { %415 = vmatmul.mubr.msk.f32.vlgmr.msra.gmra.mxu0 %vm97_vm1, %v91_v8  ;;  %425 = vmatprep.subr.mxu1 %v632_v0  ;;  %v267_v30 = vld [vmem:[#allocation10 + $0x38] sm:$0xff]  ;;  %v266_v31 = vld [vmem:[#allocation10 + $0x30] sm:$0xff]  ;;  %v265_v32 = vld [vmem:[#allocation10 + $0x28] sm:$0xff] }
  0x47   :  { %452 = vmatprep.subr.mxu0 %v632_v0  ;;  %426 = vmatpush3.msra.mxu1 %v183_v10  ;;  %v264_v33 = vld [vmem:[#allocation10 + $0x20] sm:$0xff]  ;;  %v263_v34 = vld [vmem:[#allocation10 + $0x18] sm:$0xff]  ;;  %v96_v35 = vld [vmem:[#allocation5] sm:$0x3] }
  0x48   :  { %484 = vmatprep.mubr.msk.f32.mxu0 %vm633_vm0, %v632_v0  ;;  %427 = vmatprep.subr.mxu1 %v632_v0  ;;  %v262_v40 = vld [vmem:[#allocation10 + $0x10] sm:$0xff]  ;;  %v261_v41 = vld [vmem:[#allocation10 + $0x8] sm:$0xff]  ;;  %v260_v42 = vld [vmem:[#allocation10] sm:$0xff] }
  0x49   :  { %428 = vmatpush3.msra.mxu1 %v182_v11  ;;  %453 = vmatpush3.msra.mxu0 %v275_v22  ;;  %v188_v43 = vld [vmem:[#allocation8] sm:$0x3]  ;;  %v276_v48 = vld [vmem:[%s747_s6] sm:$0x3] }
  0x4a   :  { %429 = vmatprep.subr.mxu1 %v632_v0  ;;  %454 = vmatprep.subr.mxu0 %v632_v0 }
  0x4b   :  { %430 = vmatpush3.msra.mxu1 %v181_v12  ;;  %455 = vmatpush3.msra.mxu0 %v274_v23 }
  0x4c   :  { %431 = vmatprep.subr.mxu1 %v632_v0  ;;  %456 = vmatprep.subr.mxu0 %v632_v0 }
  0x4d   :  { %432 = vmatpush3.msra.mxu1 %v180_v13  ;;  %457 = vmatpush3.msra.mxu0 %v273_v24 }
  0x4e   :  { %433 = vmatprep.subr.mxu1 %v632_v0  ;;  %458 = vmatprep.subr.mxu0 %v632_v0 }
  0x4f   :  { %434 = vmatpush3.msra.mxu1 %v179_v14  ;;  %459 = vmatpush3.msra.mxu0 %v272_v25 }
  0x50   :  { %435 = vmatprep.subr.mxu1 %v632_v0  ;;  %460 = vmatprep.subr.mxu0 %v632_v0 }
  0x51   :  { %436 = vmatpush3.msra.mxu1 %v178_v15  ;;  %461 = vmatpush3.msra.mxu0 %v271_v26 }
  0x52   :  { %437 = vmatprep.subr.mxu1 %v632_v0  ;;  %462 = vmatprep.subr.mxu0 %v632_v0 }
  0x53   :  { %438 = vmatpush3.msra.mxu1 %v177_v16  ;;  %463 = vmatpush3.msra.mxu0 %v270_v27 }
  0x54   :  { %439 = vmatprep.subr.mxu1 %v632_v0  ;;  %464 = vmatprep.subr.mxu0 %v632_v0 }
  0x55   :  { %440 = vmatpush3.msra.mxu1 %v176_v17  ;;  %465 = vmatpush3.msra.mxu0 %v269_v28 }
  0x56   :  { %441 = vmatprep.subr.mxu1 %v632_v0  ;;  %466 = vmatprep.subr.mxu0 %v632_v0 }
  0x57   :  { %442 = vmatpush3.msra.mxu1 %v175_v18  ;;  %467 = vmatpush3.msra.mxu0 %v268_v29 }
  0x58   :  { %443 = vmatprep.subr.mxu1 %v632_v0  ;;  %468 = vmatprep.subr.mxu0 %v632_v0 }
  0x59   :  { %444 = vmatpush3.msra.mxu1 %v174_v19  ;;  %469 = vmatpush3.msra.mxu0 %v267_v30 }
  0x5a   :  { %445 = vmatprep.subr.mxu1 %v632_v0  ;;  %470 = vmatprep.subr.mxu0 %v632_v0 }
  0x5b   :  { %446 = vmatpush3.msra.mxu1 %v173_v20  ;;  %471 = vmatpush3.msra.mxu0 %v266_v31 }
  0x5c   :  { %447 = vmatprep.subr.mxu1 %v632_v0  ;;  %472 = vmatprep.subr.mxu0 %v632_v0 }
  0x5d   :  { %448 = vmatpush3.msra.mxu1 %v172_v21  ;;  %473 = vmatpush3.msra.mxu0 %v265_v32 }
  0x5e   :  { %474 = vmatprep.subr.mxu0 %v632_v0 }
  0x5f   :  { %475 = vmatpush3.msra.mxu0 %v264_v33 }
  0x60   :  { %476 = vmatprep.subr.mxu0 %v632_v0 }
  0x61   :  { %477 = vmatpush3.msra.mxu0 %v263_v34 }
  0x62   :  { %478 = vmatprep.subr.mxu0 %v632_v0 }
  0x63   :  { %479 = vmatpush3.msra.mxu0 %v262_v40 }
  0x64   :  { %480 = vmatprep.subr.mxu0 %v632_v0 }
  0x65   :  { %481 = vmatpush3.msra.mxu0 %v261_v41 }
  0x66   :  { %482 = vmatprep.subr.mxu0 %v632_v0 }
  0x67   :  { %483 = vmatpush3.msra.mxu0 %v260_v42 }
 0x106   :  { %v167_v36 = vpop.f32.mrf.mxu0 }
 0x107   :  { %v168_v37 = vadd.f32 %v167_v36, %v96_v35 }
 0x108   :  { %v416_v38 = vpop.f32.mrf.mxu0 }
 0x109   :  { %v171_v39 = vmax.f32 %v168_v37, 0.0 }
 0x10b   :  { %450 = vmatmul.mubr.f32.vlgmr.msra.gmra.mxu1 %v171_v39 }
 0x1cb   :  { %v255_v44 = vpop.f32.mrf.mxu1 }
 0x1cc   :  { %v256_v45 = vadd.f32 %v255_v44, %v188_v43 }
 0x1cd   :  { %v451_v46 = vpop.f32.mrf.mxu1 }
 0x1ce   :  { %v259_v47 = vmax.f32 %v256_v45, 0.0 }
 0x1d0   :  { %485 = vmatmul.mubr.f32.vlgmr.msra.gmra.mxu0 %v259_v47 }
 0x290   :  { %v343_v49 = vpop.f32.mrf.mxu0 }
 0x291   :  { %v344_v50 = vadd.f32 %v343_v49, %v276_v48 }
 0x292   :  { %v486_v51 = vpop.f32.mrf.mxu0 }
 0x293   :  { %348 = vst.msk [vmem:[#allocation11] sm:$0x3] %vm347_vm2, %v344_v50 }
 0x294   :  { %608 = shalt.err (!%p605_p1)
}
 0x295   :  { %358 = dma.vmem_to_hbm [thread:$0]  %s356_s27, 32, %s748_s7, [#allocation4]  }
 0x296   :  { %623 = dma.done.wait [#allocation4], 32  }
 0x297   :  { %624 = vsyncadd [#allocation4], 4294967264 }
 0x298   :  { %362 = vsyncpa [#allocation3], 1 }
 0x299   :  { %363 = vsyncpa [#allocation6], 1 }
 0x29a   :  { %364 = vsyncpa [#allocation9], 1 }
 0x29b   :  { %365 = vsyncpa [#allocation4], 1 }

</bundles_post_ra>
